<compile_context>
chip_gen: v7x
topology: tpu7x:2x2x1
jax: 0.10.0
libtpu: 0.0.40
codegen_flags: <defaults>
</compile_context>

<pallas_src>
import jax
import jax.numpy as jnp
from jax import lax
from jax.experimental import pallas as pl
from jax.experimental.pallas import tpu as pltpu


def _round_up(v, m):
    return (v + m - 1) // m * m


def _tensorcore_count():
    """Best-effort TensorCores-per-chip (2 on v7x, 1 on v5e/v6e). Never raises."""
    try:
        info = pltpu.get_tpu_info()
        for name in ("num_tensorcores", "tensorcore_count", "num_cores",
                     "core_count"):
            v = getattr(info, name, None)
            if isinstance(v, int) and v > 0:
                return v
    except Exception:
        pass
    try:
        if "v7" in jax.devices()[0].device_kind.lower():
            return 2
    except Exception:
        pass
    return 1


def _make_node_kernel(nb, offsets, lout, cout_pad):
    """Kernel factory.

    Block layout per grid step:
      w_ref: (9, Cout_pad, C_pad)   per-tap fused (x|y) weights, transposed
      b_ref: (Cout_pad, 1)          combined bias bx + by
      x_ref: (nb, C_pad, Lin)       zero-padded input images, spatial-flattened
      o_ref: (nb, Cout_pad, Lout_pad)  lane-dense extended-width output
    """
    def kernel(w_ref, b_ref, x_ref, o_ref):
        # Hoisted once: per-tap weight tiles and broadcast bias (acc init).
        w_taps = [w_ref[t] for t in range(len(offsets))]
        b0 = jnp.broadcast_to(b_ref[...], (cout_pad, lout)).astype(jnp.float32)
        for i in range(nb):
            xi = x_ref[i]                         # (C_pad, Lin)
            acc = b0
            for t, off in enumerate(offsets):
                # 3x3 conv tap == matmul against a lane-shifted input view.
                acc = acc + jnp.dot(w_taps[t], xi[:, off:off + lout],
                                    preferred_element_type=jnp.float32)
            o_ref[i] = acc.astype(o_ref.dtype)
    return kernel


def node_forward(x_nchw, y_nchw, wx, wy, bx, by):
    """Fused Node forward: conv3x3(x,wx)+bx + conv3x3(y,wy)+by, same pad, stride 1.

    x_nchw: (N, Cx, H, W)   y_nchw: (N, Cy, H, W)
    wx: (3, 3, Cx, Cout)    wy: (3, 3, Cy, Cout)   (HWIO)
    bx, by: (Cout,)
    returns: (N, Cout, H, W)
    """
    N, Cx, H, W = x_nchw.shape
    Cy = y_nchw.shape[1]
    Cout = wx.shape[-1]
    dt = x_nchw.dtype

    C = Cx + Cy
    C_pad = _round_up(C, 8)            # contraction dim: pad to 8, not 128
    Cout_pad = _round_up(Cout, 8)
    Wp = W + 2                         # padded row width
    Lout = H * Wp                      # extended-width output (junk cols sliced later)
    Lout_pad = _round_up(Lout, 128)    # lane-dense, unmasked stores
    offsets = [kh * Wp + kw for kh in range(3) for kw in range(3)]
    max_off = offsets[-1]
    # Enough padded rows so every (offset + Lout_pad) read stays in-bounds.
    rows_total = max(H + 3, -(-(max_off + Lout_pad) // Wp))
    Lin = rows_total * Wp

    # ---------------- wrapper layout (2 real data passes) -------------------
    # Channel-concat x|y (NCHW keeps channels as the sublane axis), then one
    # pad: channels C->C_pad, rows +1 top / +(rows_total-1-H) bottom, cols +1/+1.
    xy = jnp.concatenate([x_nchw, y_nchw], axis=1)                 # (N, C, H, W)
    xy = jnp.pad(xy, ((0, 0), (0, C_pad - C),
                      (1, rows_total - 1 - H), (1, 1)))            # (N,C_pad,rows,Wp)
    inp = xy.reshape(N, C_pad, Lin)                                # free reshape

    # Per-tap weights, transposed to (Cout, Cin) so out stays lane-dense in M.
    w = jnp.concatenate([wx, wy], axis=2).reshape(9, C, Cout)      # tap-major
    w = jnp.transpose(w, (0, 2, 1))                                # (9, Cout, C)
    w_all = jnp.zeros((9, Cout_pad, C_pad), dt).at[:, :Cout, :C].set(w.astype(dt))
    b_all = jnp.zeros((Cout_pad, 1), dt).at[:Cout, 0].set((bx + by).astype(dt))

    # ---------------- grid selection (generation-aware) ---------------------
    n_tc = _tensorcore_count()
    nb = N // 2 if (n_tc >= 2 and N % 2 == 0) else N     # split only on 2-TC chips
    # VMEM-budget cap on the per-step block (double-buffered in + out).
    bytes_per_img = (C_pad * Lin + Cout_pad * Lout_pad) * dt.itemsize
    budget = 24 * 1024 * 1024
    while nb > 1 and (N % nb != 0 or 2 * nb * bytes_per_img > budget):
        nb -= 1
    gn = N // nb

    kernel = _make_node_kernel(nb, offsets, Lout_pad, Cout_pad)

    out_ext = pl.pallas_call(
        kernel,
        out_shape=jax.ShapeDtypeStruct((N, Cout_pad, Lout_pad), dt),
        grid=(gn,),
        in_specs=[
            pl.BlockSpec((9, Cout_pad, C_pad), lambda n: (0, 0, 0)),
            pl.BlockSpec((Cout_pad, 1), lambda n: (0, 0)),
            pl.BlockSpec((nb, C_pad, Lin), lambda n: (n, 0, 0)),
        ],
        out_specs=pl.BlockSpec((nb, Cout_pad, Lout_pad), lambda n: (n, 0, 0)),
        compiler_params=pltpu.CompilerParams(
            dimension_semantics=("parallel",)),
    )(w_all, b_all, inp)

    # (N, Cout_pad, Lout_pad) -> (N, Cout, H, W): drop junk lanes / pad channels.
    out = out_ext[:, :Cout, :Lout].reshape(N, Cout, H, Wp)[:, :, :, :W]
    return out


def _reference(x_nchw, y_nchw, wx, wy, bx, by):
    """Pure-JAX reference (lax.conv) for correctness checking."""
    def conv(inp_nchw, w_hwio, b):
        inp = jnp.transpose(inp_nchw, (0, 2, 3, 1))
        out = lax.conv_general_dilated(
            inp, w_hwio, window_strides=(1, 1), padding="SAME",
            dimension_numbers=("NHWC", "HWIO", "NHWC"))
        out = out + b[None, None, None, :]
        return jnp.transpose(out, (0, 3, 1, 2))
    return conv(x_nchw, wx, bx) + conv(y_nchw, wy, by)


if __name__ == "__main__":
    # Small shapes consistent with the Node module:
    # batch=2, x has 4 channels, y has 6 channels, spatial 16x16,
    # node produces channels=8, stride=1.
    N, Cx, Cy, H, W, Cout = 2, 4, 6, 16, 16, 8

    key = jax.random.PRNGKey(0)
    kx, ky, kwx, kwy, kbx, kby = jax.random.split(key, 6)

    x = jax.random.normal(kx, (N, Cx, H, W), dtype=jnp.float32)
    y = jax.random.normal(ky, (N, Cy, H, W), dtype=jnp.float32)
    wx = jax.random.normal(kwx, (3, 3, Cx, Cout), dtype=jnp.float32) * 0.1
    wy = jax.random.normal(kwy, (3, 3, Cy, Cout), dtype=jnp.float32) * 0.1
    bx = jax.random.normal(kbx, (Cout,), dtype=jnp.float32) * 0.1
    by = jax.random.normal(kby, (Cout,), dtype=jnp.float32) * 0.1

    out = node_forward(x, y, wx, wy, bx, by)
    out = jax.block_until_ready(out)

    ref = _reference(x, y, wx, wy, bx, by)
    assert out.shape == (N, Cout, H, W)
    assert jnp.allclose(out, ref, atol=1e-3, rtol=1e-3)

    print("KERNEL_OK")
</pallas_src>

<mosaic_0001>
module attributes {stable_mosaic.version = 11 : i64} {
  func.func @kernel(%arg0: i32, %arg1: memref<9x8x16xf32, #tpu.memory_space<vmem>>, %arg2: memref<8x1xf32, #tpu.memory_space<vmem>>, %arg3: memref<2x16x432xf32, #tpu.memory_space<vmem>>, %arg4: memref<2x8x384xf32, #tpu.memory_space<vmem>>) attributes {dimension_semantics = [#tpu.dimension_semantics<parallel>], iteration_bounds = array<i64: 1>, scalar_prefetch = 0 : i64, scratch_operands = 0 : i64, tpu.core_type = #tpu.core_type<tc>, window_params = [{pipeline_mode = #tpu.pipeline_mode<synchronous>, transform_indices = @transform_0, window_bounds = array<i64: 9, 8, 16>}, {pipeline_mode = #tpu.pipeline_mode<synchronous>, transform_indices = @transform_1, window_bounds = array<i64: 8, 1>}, {transform_indices = @transform_2, window_bounds = array<i64: 2, 16, 432>}, {transform_indices = @transform_3, window_bounds = array<i64: 2, 8, 384>}]} {
    %c0 = arith.constant 0 : index
    %c0_0 = arith.constant 0 : index
    %c0_1 = arith.constant 0 : index
    %0 = vector.load %arg1[%c0, %c0_0, %c0_1] : memref<9x8x16xf32, #tpu.memory_space<vmem>>, vector<1x8x16xf32>
    %1 = vector.shape_cast %0 : vector<1x8x16xf32> to vector<8x16xf32>
    %c1 = arith.constant 1 : index
    %c0_2 = arith.constant 0 : index
    %c0_3 = arith.constant 0 : index
    %2 = vector.load %arg1[%c1, %c0_2, %c0_3] : memref<9x8x16xf32, #tpu.memory_space<vmem>>, vector<1x8x16xf32>
    %3 = vector.shape_cast %2 : vector<1x8x16xf32> to vector<8x16xf32>
    %c2 = arith.constant 2 : index
    %c0_4 = arith.constant 0 : index
    %c0_5 = arith.constant 0 : index
    %4 = vector.load %arg1[%c2, %c0_4, %c0_5] : memref<9x8x16xf32, #tpu.memory_space<vmem>>, vector<1x8x16xf32>
    %5 = vector.shape_cast %4 : vector<1x8x16xf32> to vector<8x16xf32>
    %c3 = arith.constant 3 : index
    %c0_6 = arith.constant 0 : index
    %c0_7 = arith.constant 0 : index
    %6 = vector.load %arg1[%c3, %c0_6, %c0_7] : memref<9x8x16xf32, #tpu.memory_space<vmem>>, vector<1x8x16xf32>
    %7 = vector.shape_cast %6 : vector<1x8x16xf32> to vector<8x16xf32>
    %c4 = arith.constant 4 : index
    %c0_8 = arith.constant 0 : index
    %c0_9 = arith.constant 0 : index
    %8 = vector.load %arg1[%c4, %c0_8, %c0_9] : memref<9x8x16xf32, #tpu.memory_space<vmem>>, vector<1x8x16xf32>
    %9 = vector.shape_cast %8 : vector<1x8x16xf32> to vector<8x16xf32>
    %c5 = arith.constant 5 : index
    %c0_10 = arith.constant 0 : index
    %c0_11 = arith.constant 0 : index
    %10 = vector.load %arg1[%c5, %c0_10, %c0_11] : memref<9x8x16xf32, #tpu.memory_space<vmem>>, vector<1x8x16xf32>
    %11 = vector.shape_cast %10 : vector<1x8x16xf32> to vector<8x16xf32>
    %c6 = arith.constant 6 : index
    %c0_12 = arith.constant 0 : index
    %c0_13 = arith.constant 0 : index
    %12 = vector.load %arg1[%c6, %c0_12, %c0_13] : memref<9x8x16xf32, #tpu.memory_space<vmem>>, vector<1x8x16xf32>
    %13 = vector.shape_cast %12 : vector<1x8x16xf32> to vector<8x16xf32>
    %c7 = arith.constant 7 : index
    %c0_14 = arith.constant 0 : index
    %c0_15 = arith.constant 0 : index
    %14 = vector.load %arg1[%c7, %c0_14, %c0_15] : memref<9x8x16xf32, #tpu.memory_space<vmem>>, vector<1x8x16xf32>
    %15 = vector.shape_cast %14 : vector<1x8x16xf32> to vector<8x16xf32>
    %c8 = arith.constant 8 : index
    %c0_16 = arith.constant 0 : index
    %c0_17 = arith.constant 0 : index
    %16 = vector.load %arg1[%c8, %c0_16, %c0_17] : memref<9x8x16xf32, #tpu.memory_space<vmem>>, vector<1x8x16xf32>
    %17 = vector.shape_cast %16 : vector<1x8x16xf32> to vector<8x16xf32>
    %c0_18 = arith.constant 0 : index
    %c0_19 = arith.constant 0 : index
    %18 = vector.load %arg2[%c0_18, %c0_19] : memref<8x1xf32, #tpu.memory_space<vmem>>, vector<8x1xf32>
    %19 = vector.shape_cast %18 : vector<8x1xf32> to vector<8x1xf32>
    %20 = vector.broadcast %19 : vector<8x1xf32> to vector<8x384xf32>
    %c0_20 = arith.constant 0 : index
    %c0_21 = arith.constant 0 : index
    %c0_22 = arith.constant 0 : index
    %21 = vector.load %arg3[%c0_20, %c0_21, %c0_22] : memref<2x16x432xf32, #tpu.memory_space<vmem>>, vector<1x16x432xf32>
    %22 = vector.shape_cast %21 : vector<1x16x432xf32> to vector<16x432xf32>
    %23 = vector.extract_strided_slice %22 {offsets = [0, 0], sizes = [16, 384], strides = [1, 1]} : vector<16x432xf32> to vector<16x384xf32>
    %cst = arith.constant dense<0.000000e+00> : vector<8x384xf32>
    %24 = tpu.matmul %1, %23, %cst {dimension_numbers = #tpu.dot_dimension_numbers<[1], [0], [0], [1], [0, 0, 1, 1], [], []>} : vector<8x16xf32>, vector<16x384xf32>, vector<8x384xf32> -> vector<8x384xf32>
    %25 = arith.addf %20, %24 : vector<8x384xf32>
    %26 = vector.extract_strided_slice %22 {offsets = [0, 1], sizes = [16, 384], strides = [1, 1]} : vector<16x432xf32> to vector<16x384xf32>
    %cst_23 = arith.constant dense<0.000000e+00> : vector<8x384xf32>
    %27 = tpu.matmul %3, %26, %cst_23 {dimension_numbers = #tpu.dot_dimension_numbers<[1], [0], [0], [1], [0, 0, 1, 1], [], []>} : vector<8x16xf32>, vector<16x384xf32>, vector<8x384xf32> -> vector<8x384xf32>
    %28 = arith.addf %25, %27 : vector<8x384xf32>
    %29 = vector.extract_strided_slice %22 {offsets = [0, 2], sizes = [16, 384], strides = [1, 1]} : vector<16x432xf32> to vector<16x384xf32>
    %cst_24 = arith.constant dense<0.000000e+00> : vector<8x384xf32>
    %30 = tpu.matmul %5, %29, %cst_24 {dimension_numbers = #tpu.dot_dimension_numbers<[1], [0], [0], [1], [0, 0, 1, 1], [], []>} : vector<8x16xf32>, vector<16x384xf32>, vector<8x384xf32> -> vector<8x384xf32>
    %31 = arith.addf %28, %30 : vector<8x384xf32>
    %32 = vector.extract_strided_slice %22 {offsets = [0, 18], sizes = [16, 384], strides = [1, 1]} : vector<16x432xf32> to vector<16x384xf32>
    %cst_25 = arith.constant dense<0.000000e+00> : vector<8x384xf32>
    %33 = tpu.matmul %7, %32, %cst_25 {dimension_numbers = #tpu.dot_dimension_numbers<[1], [0], [0], [1], [0, 0, 1, 1], [], []>} : vector<8x16xf32>, vector<16x384xf32>, vector<8x384xf32> -> vector<8x384xf32>
    %34 = arith.addf %31, %33 : vector<8x384xf32>
    %35 = vector.extract_strided_slice %22 {offsets = [0, 19], sizes = [16, 384], strides = [1, 1]} : vector<16x432xf32> to vector<16x384xf32>
    %cst_26 = arith.constant dense<0.000000e+00> : vector<8x384xf32>
    %36 = tpu.matmul %9, %35, %cst_26 {dimension_numbers = #tpu.dot_dimension_numbers<[1], [0], [0], [1], [0, 0, 1, 1], [], []>} : vector<8x16xf32>, vector<16x384xf32>, vector<8x384xf32> -> vector<8x384xf32>
    %37 = arith.addf %34, %36 : vector<8x384xf32>
    %38 = vector.extract_strided_slice %22 {offsets = [0, 20], sizes = [16, 384], strides = [1, 1]} : vector<16x432xf32> to vector<16x384xf32>
    %cst_27 = arith.constant dense<0.000000e+00> : vector<8x384xf32>
    %39 = tpu.matmul %11, %38, %cst_27 {dimension_numbers = #tpu.dot_dimension_numbers<[1], [0], [0], [1], [0, 0, 1, 1], [], []>} : vector<8x16xf32>, vector<16x384xf32>, vector<8x384xf32> -> vector<8x384xf32>
    %40 = arith.addf %37, %39 : vector<8x384xf32>
    %41 = vector.extract_strided_slice %22 {offsets = [0, 36], sizes = [16, 384], strides = [1, 1]} : vector<16x432xf32> to vector<16x384xf32>
    %cst_28 = arith.constant dense<0.000000e+00> : vector<8x384xf32>
    %42 = tpu.matmul %13, %41, %cst_28 {dimension_numbers = #tpu.dot_dimension_numbers<[1], [0], [0], [1], [0, 0, 1, 1], [], []>} : vector<8x16xf32>, vector<16x384xf32>, vector<8x384xf32> -> vector<8x384xf32>
    %43 = arith.addf %40, %42 : vector<8x384xf32>
    %44 = vector.extract_strided_slice %22 {offsets = [0, 37], sizes = [16, 384], strides = [1, 1]} : vector<16x432xf32> to vector<16x384xf32>
    %cst_29 = arith.constant dense<0.000000e+00> : vector<8x384xf32>
    %45 = tpu.matmul %15, %44, %cst_29 {dimension_numbers = #tpu.dot_dimension_numbers<[1], [0], [0], [1], [0, 0, 1, 1], [], []>} : vector<8x16xf32>, vector<16x384xf32>, vector<8x384xf32> -> vector<8x384xf32>
    %46 = arith.addf %43, %45 : vector<8x384xf32>
    %47 = vector.extract_strided_slice %22 {offsets = [0, 38], sizes = [16, 384], strides = [1, 1]} : vector<16x432xf32> to vector<16x384xf32>
    %cst_30 = arith.constant dense<0.000000e+00> : vector<8x384xf32>
    %48 = tpu.matmul %17, %47, %cst_30 {dimension_numbers = #tpu.dot_dimension_numbers<[1], [0], [0], [1], [0, 0, 1, 1], [], []>} : vector<8x16xf32>, vector<16x384xf32>, vector<8x384xf32> -> vector<8x384xf32>
    %49 = arith.addf %46, %48 : vector<8x384xf32>
    %c0_31 = arith.constant 0 : index
    %c0_32 = arith.constant 0 : index
    %c0_33 = arith.constant 0 : index
    %50 = vector.load %arg4[%c0_31, %c0_32, %c0_33] : memref<2x8x384xf32, #tpu.memory_space<vmem>>, vector<1x8x384xf32>
    %51 = vector.shape_cast %50 : vector<1x8x384xf32> to vector<8x384xf32>
    %52 = vector.shape_cast %49 : vector<8x384xf32> to vector<1x8x384xf32>
    tpu.vector_store %arg4[%c0_31, %c0_32, %c0_33], %52 {strides = array<i32>} : memref<2x8x384xf32, #tpu.memory_space<vmem>>, vector<1x8x384xf32>,
    %c1_34 = arith.constant 1 : index
    %c0_35 = arith.constant 0 : index
    %c0_36 = arith.constant 0 : index
    %53 = vector.load %arg3[%c1_34, %c0_35, %c0_36] : memref<2x16x432xf32, #tpu.memory_space<vmem>>, vector<1x16x432xf32>
    %54 = vector.shape_cast %53 : vector<1x16x432xf32> to vector<16x432xf32>
    %55 = vector.extract_strided_slice %54 {offsets = [0, 0], sizes = [16, 384], strides = [1, 1]} : vector<16x432xf32> to vector<16x384xf32>
    %cst_37 = arith.constant dense<0.000000e+00> : vector<8x384xf32>
    %56 = tpu.matmul %1, %55, %cst_37 {dimension_numbers = #tpu.dot_dimension_numbers<[1], [0], [0], [1], [0, 0, 1, 1], [], []>} : vector<8x16xf32>, vector<16x384xf32>, vector<8x384xf32> -> vector<8x384xf32>
    %57 = arith.addf %20, %56 : vector<8x384xf32>
    %58 = vector.extract_strided_slice %54 {offsets = [0, 1], sizes = [16, 384], strides = [1, 1]} : vector<16x432xf32> to vector<16x384xf32>
    %cst_38 = arith.constant dense<0.000000e+00> : vector<8x384xf32>
    %59 = tpu.matmul %3, %58, %cst_38 {dimension_numbers = #tpu.dot_dimension_numbers<[1], [0], [0], [1], [0, 0, 1, 1], [], []>} : vector<8x16xf32>, vector<16x384xf32>, vector<8x384xf32> -> vector<8x384xf32>
    %60 = arith.addf %57, %59 : vector<8x384xf32>
    %61 = vector.extract_strided_slice %54 {offsets = [0, 2], sizes = [16, 384], strides = [1, 1]} : vector<16x432xf32> to vector<16x384xf32>
    %cst_39 = arith.constant dense<0.000000e+00> : vector<8x384xf32>
    %62 = tpu.matmul %5, %61, %cst_39 {dimension_numbers = #tpu.dot_dimension_numbers<[1], [0], [0], [1], [0, 0, 1, 1], [], []>} : vector<8x16xf32>, vector<16x384xf32>, vector<8x384xf32> -> vector<8x384xf32>
    %63 = arith.addf %60, %62 : vector<8x384xf32>
    %64 = vector.extract_strided_slice %54 {offsets = [0, 18], sizes = [16, 384], strides = [1, 1]} : vector<16x432xf32> to vector<16x384xf32>
    %cst_40 = arith.constant dense<0.000000e+00> : vector<8x384xf32>
    %65 = tpu.matmul %7, %64, %cst_40 {dimension_numbers = #tpu.dot_dimension_numbers<[1], [0], [0], [1], [0, 0, 1, 1], [], []>} : vector<8x16xf32>, vector<16x384xf32>, vector<8x384xf32> -> vector<8x384xf32>
    %66 = arith.addf %63, %65 : vector<8x384xf32>
    %67 = vector.extract_strided_slice %54 {offsets = [0, 19], sizes = [16, 384], strides = [1, 1]} : vector<16x432xf32> to vector<16x384xf32>
    %cst_41 = arith.constant dense<0.000000e+00> : vector<8x384xf32>
    %68 = tpu.matmul %9, %67, %cst_41 {dimension_numbers = #tpu.dot_dimension_numbers<[1], [0], [0], [1], [0, 0, 1, 1], [], []>} : vector<8x16xf32>, vector<16x384xf32>, vector<8x384xf32> -> vector<8x384xf32>
    %69 = arith.addf %66, %68 : vector<8x384xf32>
    %70 = vector.extract_strided_slice %54 {offsets = [0, 20], sizes = [16, 384], strides = [1, 1]} : vector<16x432xf32> to vector<16x384xf32>
    %cst_42 = arith.constant dense<0.000000e+00> : vector<8x384xf32>
    %71 = tpu.matmul %11, %70, %cst_42 {dimension_numbers = #tpu.dot_dimension_numbers<[1], [0], [0], [1], [0, 0, 1, 1], [], []>} : vector<8x16xf32>, vector<16x384xf32>, vector<8x384xf32> -> vector<8x384xf32>
    %72 = arith.addf %69, %71 : vector<8x384xf32>
    %73 = vector.extract_strided_slice %54 {offsets = [0, 36], sizes = [16, 384], strides = [1, 1]} : vector<16x432xf32> to vector<16x384xf32>
    %cst_43 = arith.constant dense<0.000000e+00> : vector<8x384xf32>
    %74 = tpu.matmul %13, %73, %cst_43 {dimension_numbers = #tpu.dot_dimension_numbers<[1], [0], [0], [1], [0, 0, 1, 1], [], []>} : vector<8x16xf32>, vector<16x384xf32>, vector<8x384xf32> -> vector<8x384xf32>
    %75 = arith.addf %72, %74 : vector<8x384xf32>
    %76 = vector.extract_strided_slice %54 {offsets = [0, 37], sizes = [16, 384], strides = [1, 1]} : vector<16x432xf32> to vector<16x384xf32>
    %cst_44 = arith.constant dense<0.000000e+00> : vector<8x384xf32>
    %77 = tpu.matmul %15, %76, %cst_44 {dimension_numbers = #tpu.dot_dimension_numbers<[1], [0], [0], [1], [0, 0, 1, 1], [], []>} : vector<8x16xf32>, vector<16x384xf32>, vector<8x384xf32> -> vector<8x384xf32>
    %78 = arith.addf %75, %77 : vector<8x384xf32>
    %79 = vector.extract_strided_slice %54 {offsets = [0, 38], sizes = [16, 384], strides = [1, 1]} : vector<16x432xf32> to vector<16x384xf32>
    %cst_45 = arith.constant dense<0.000000e+00> : vector<8x384xf32>
    %80 = tpu.matmul %17, %79, %cst_45 {dimension_numbers = #tpu.dot_dimension_numbers<[1], [0], [0], [1], [0, 0, 1, 1], [], []>} : vector<8x16xf32>, vector<16x384xf32>, vector<8x384xf32> -> vector<8x384xf32>
    %81 = arith.addf %78, %80 : vector<8x384xf32>
    %c1_46 = arith.constant 1 : index
    %c0_47 = arith.constant 0 : index
    %c0_48 = arith.constant 0 : index
    %82 = vector.load %arg4[%c1_46, %c0_47, %c0_48] : memref<2x8x384xf32, #tpu.memory_space<vmem>>, vector<1x8x384xf32>
    %83 = vector.shape_cast %82 : vector<1x8x384xf32> to vector<8x384xf32>
    %84 = vector.shape_cast %81 : vector<8x384xf32> to vector<1x8x384xf32>
    tpu.vector_store %arg4[%c1_46, %c0_47, %c0_48], %84 {strides = array<i32>} : memref<2x8x384xf32, #tpu.memory_space<vmem>>, vector<1x8x384xf32>,
    return
  }
  func.func @transform_0(%arg0: i32) -> (i32, i32, i32) {
    %c0_i32 = arith.constant 0 : i32
    %c0_i32_0 = arith.constant 0 : i32
    %c0_i32_1 = arith.constant 0 : i32
    %c0_i32_2 = arith.constant 0 : i32
    return %c0_i32, %c0_i32_0, %c0_i32_1 : i32, i32, i32
  }
  func.func @transform_1(%arg0: i32) -> (i32, i32) {
    %c0_i32 = arith.constant 0 : i32
    %c0_i32_0 = arith.constant 0 : i32
    %c0_i32_1 = arith.constant 0 : i32
    return %c0_i32, %c0_i32_0 : i32, i32
  }
  func.func @transform_2(%arg0: i32) -> (i32, i32, i32) {
    %c0_i32 = arith.constant 0 : i32
    %c0_i32_0 = arith.constant 0 : i32
    %c0_i32_1 = arith.constant 0 : i32
    return %arg0, %c0_i32, %c0_i32_0 : i32, i32, i32
  }
  func.func @transform_3(%arg0: i32) -> (i32, i32, i32) {
    %c0_i32 = arith.constant 0 : i32
    %c0_i32_0 = arith.constant 0 : i32
    %c0_i32_1 = arith.constant 0 : i32
    return %arg0, %c0_i32, %c0_i32_0 : i32, i32, i32
  }
}

</mosaic_0001>

<bundles_post_ra>
// kernel: tpu_custom_call.1
= control target key start
LH: loop header
LB: loop body
LE: loop exit
PB: predicated region body
PF: predicated region fallthrough
CT: control target
= control target key end

     0   :  { %8 = vsyncpa [#allocation3], 0  ;;  %s4481_s0 = inlined_call_operand.hbm [shape: f32[9,8,16], index: 0, kind: input, shape index: {}]   ;;  %s4482_s1 = inlined_call_operand.vmem [shape: f32[8,1], index: 1, kind: input, shape index: {}]   ;;  %s4483_s2 = inlined_call_operand.hbm [shape: f32[2,16,432], index: 2, kind: input, shape index: {}]   ;;  %s4484_s3 = inlined_call_operand.hbm [shape: f32[2,8,384], index: 3, kind: output, shape index: {}]  }
   0x1   :  { %9 = vsyncpa [#allocation6], 0 }
   0x2   :  { %10 = vsyncpa [#allocation4], 0  ;;  %s4026_s12 = smov [#allocation2]   ;;  %s3954_s16 = scalar_lea.hbm %s4481_s0, 1152 }
   0x3   :  { %s16_s13 = sshll.u32 %s4026_s12, 4  ;;  %p3955_p0 = scmp.ne.s32.totalorder %s4481_s0, %s3954_s16  ;;  %s17_s13 = int_to_ptr.vmem [resolvable:$true] %s16_s13 }
   0x4   :  { %p3958_p1 = scmp.lt.u32.totalorder %s3954_s16, %s4481_s0 }
   0x6   :  { %p3960_p2 = pnand %p3958_p1, %p3955_p0 }
   0x8   :  { %3963 = shalt.err (!%p3960_p2)
}
   0x9   :  { %s3964_s21 = scalar_lea.vmem %s17_s13, 1152  ;;  %p3969_p4 = scmp.lt.s32.totalorder %s17_s13, %s17_s13 }
   0xa   :  { %p3965_p3 = scmp.ne.s32.totalorder %s17_s13, %s3964_s21  ;;  %p3970_p5 = scmp.lt.s32.totalorder %s3964_s21, %s3964_s21 }
   0xc   :  { %p3971_p6 = por %p3970_p5, %p3969_p4 }
   0xe   :  { %p3972_p7 = pnand %p3971_p6, %p3965_p3 }
  0x10   :  { %3975 = shalt.err (!%p3972_p7)
}
  0x11   :  { %s4027_s22 = smov 128   ;;  %s4028_s23 = smov 8  }
  0x12   :  { %22 = dma.hbm_to_vmem [thread:$0]  %s4481_s0, 1152, %s17_s13, [#allocation3], %s4027_s22, %s4027_s22, %s4028_s23  }
  0x13   :  { %s4029_s26 = smov [#allocation5]   ;;  %s3976_s30 = scalar_lea.hbm %s4483_s2, 2048 }
  0x14   :  { %s30_s27 = sshll.u32 %s4029_s26, 4  ;;  %p3977_p8 = scmp.ne.s32.totalorder %s4483_s2, %s3976_s30  ;;  %s31_s27 = int_to_ptr.vmem [resolvable:$true] %s30_s27 }
  0x15   :  { %p3980_p9 = scmp.lt.u32.totalorder %s3976_s30, %s4483_s2 }
  0x17   :  { %p3982_p10 = pnand %p3980_p9, %p3977_p8 }
  0x19   :  { %3985 = shalt.err (!%p3982_p10)
}
  0x1a   :  { %s3986_s8 = scalar_lea.vmem %s31_s27, 2048  ;;  %p3991_p12 = scmp.lt.s32.totalorder %s31_s27, %s31_s27 }
  0x1b   :  { %p3987_p11 = scmp.ne.s32.totalorder %s31_s27, %s3986_s8  ;;  %p3992_p13 = scmp.lt.s32.totalorder %s3986_s8, %s3986_s8 }
  0x1d   :  { %p3993_p0 = por %p3992_p13, %p3991_p12 }
  0x1f   :  { %p3994_p1 = pnand %p3993_p0, %p3987_p11 }
  0x21   :  { %3997 = shalt.err (!%p3994_p1)
}
  0x22   :  { %s4030_s0 = smov 512   ;;  %s4031_s9 = smov 32  }
  0x23   :  { %36 = dma.hbm_to_vmem [thread:$0]  %s4483_s2, 2048, %s31_s27, [#allocation6], %s4030_s0, %s4030_s0, %s4031_s9  }
  0x24   :  { %4020 = dma.done.wait [#allocation3], 1152  }
  0x25   :  { %4021 = vsyncadd [#allocation3], 4294966144 }
  0x26   :  { %4022 = dma.done.wait [#allocation6], 2048  }
  0x27   :  { %4023 = vsyncadd [#allocation6], 4294965248  ;;  %v4032_v0 = vmov 0.0|0.0   ;;  %vm4033_vm0 = vmmov 0   ;;  %v4034_v1 = vmov 0.0   ;;  %v67_v2 = vld [vmem:[#allocation5 + $0x8] sm:$0xff] }
  0x28   :  { %3420 = vmatprep.subr.bf16.mxu1 %v4032_v0  ;;  %3294 = vmatprep.mubr.msk.f32.mxu1 %vm4033_vm0, %v4034_v1  ;;  %v68_v3 = vld [vmem:[#allocation5 + $0x10] sm:$0xff]  ;;  %v66_v4 = vld [vmem:[#allocation5] sm:$0xff]  ;;  %v71_v7 = vld [vmem:[#allocation5 + $0x28] sm:$0xff]  ;;  %s4035_s2 = smov 127   ;;  %s4036_s12 = smov 126   ;;  %vm74_vm1 = vcmask 130048  }
  0x29   :  { %142 = vmatprep.mubr.f32.mxu0 %v4034_v1  ;;  %v4095_v5 = vpack.i.bf16 %v68_v3, %v67_v2  ;;  %v70_v6 = vld [vmem:[#allocation5 + $0x20] sm:$0xff]  ;;  %v72_v8 = vld [vmem:[#allocation5 + $0x30] sm:$0xff]  ;;  %v69_v10 = vld [vmem:[#allocation5 + $0x18] sm:$0xff]  ;;  %v3416_v14 = vpack.c.bf16 %v71_v7, %v67_v2  ;;  %s4037_s13 = smov 110   ;;  %s4038_s14 = smov 109   ;;  %vm246_vm2 = vcmask 1039360  }
  0x2a   :  { %v4097_v9 = vpack.i.bf16 %v70_v6, %v66_v4  ;;  %v73_v11 = vld [vmem:[#allocation5 + $0x38] sm:$0xff]  ;;  %v3638_v12 = vpack.i.bf16 %v72_v8, %v71_v7  ;;  %v3421_v15 = vpack.c.bf16 %v72_v8, %v68_v3  ;;  %v3418_v16 = vpack.c.bf16 %v70_v6, %v66_v4  ;;  %s4039_s15 = smov 108   ;;  %s4040_s16 = smov 92   ;;  %v4151_v18 = vld [vmem:[#allocation5 + $0x48] sm:$0xff]  ;;  %v4153_v19 = vld [vmem:[#allocation5 + $0x50] sm:$0xff] }
  0x2b   :  { %3634 = vrot.lane.b32.xlu0 %v4095_v5, %s4035_s2  ;;  %v3648_v13 = vpack.i.bf16 %v73_v11, %v69_v10  ;;  %3417 = vmatprep.subr.bf16.mxu0 %v3416_v14  ;;  %v4111_v17 = vld [vmem:[#allocation2] sm:$0xff]  ;;  %s4041_s17 = smov 91   ;;  %v4155_v20 = vld [vmem:[#allocation5 + $0x68] sm:$0xff]  ;;  %v4157_v21 = vld [vmem:[#allocation5 + $0x70] sm:$0xff]  ;;  %s4042_s18 = smov 90   ;;  %v3793_v27 = vpack.i.bf16 %v4153_v19, %v4151_v18  ;;  %vm422_vm3 = vcmask 1031168  }
  0x2c   :  { %3644 = vrot.lane.b32.xlu1 %v4097_v9, %s4035_s2  ;;  %3422 = vmatpush3.bf16.msra.mxu1 %v3421_v15  ;;  %v4159_v22 = vld [vmem:[#allocation5 + $0x40] sm:$0xff]  ;;  %v3479_v24 = vpack.c.bf16 %v4155_v20, %v4151_v18  ;;  %v3484_v25 = vpack.c.bf16 %v4157_v21, %v4153_v19  ;;  %v3798_v28 = vpack.i.bf16 %v4157_v21, %v4155_v20  ;;  %v1645_v29 = vld [vmem:[#allocation5 + $0x58] sm:$0xff]  ;;  %v4043_v7 = vmov 0  }
  0x2d   :  { %3419 = vmatpush1.bf16.msra.mxu0 %v3418_v16  ;;  %3427 = vmatprep.subr.bf16.mxu1 %v4032_v0  ;;  %v4161_v23 = vld [vmem:[#allocation5 + $0x60] sm:$0xff]  ;;  %v1649_v30 = vld [vmem:[#allocation5 + $0x78] sm:$0xff]  ;;  %vm598_vm4 = vcmask 900096   ;;  %vm774_vm5 = vcmask 891904   ;;  %vm950_vm6 = vcmask 883712   ;;  %vm1126_vm7 = vcmask 752640  }
  0x2e   :  { %v3481_v26 = vpack.c.bf16 %v4161_v23, %v4159_v22  ;;  %v3803_v31 = vpack.i.bf16 %v4161_v23, %v4159_v22  ;;  %v3808_v32 = vpack.i.bf16 %v1649_v30, %v1645_v29  ;;  %v4219_v60 = vld [vmem:[#allocation2 + $0x8] sm:$0xff]  ;;  %v60_v62 = vld [vmem:[%s4482_s1] sm:$0xff]  ;;  %3953 = vset.pattern.permute.xlu0 %v4043_v7  ;;  %vm1302_vm8 = vcmask 744448   ;;  %s4044_s1 = smov [#allocation7]  }
  0x2f   :  { %3639 = vrot.lane.b32.xlu0 %v3638_v12, %s4035_s2  ;;  %3295 = vmatmul.mubr.msk.f32.vlgmr.msra.gmra.mrb[0].mxu1 %vm74_vm1, %v4111_v17  ;;  %vm1478_vm9 = vcmask 736256   ;;  %s3187_s21 = sshll.u32 %s4044_s1, 4  ;;  %s3188_s21 = int_to_ptr.vmem [resolvable:$true] %s3187_s21 }
  0x30   :  { %3649 = vrot.lane.b32.xlu1 %v3648_v13, %s4035_s2  ;;  %3200 = vmatmul.mubr.msk.f32.vlgmr.msra.gmra.mrb[0].mxu0 %vm74_vm1, %v4111_v17  ;;  %s3998_s22 = scalar_lea.vmem %s3188_s21, 768  ;;  %p4003_p3 = scmp.lt.s32.totalorder %s3188_s21, %s3188_s21 }
  0x31   :  { %3301 = vmatprep.mubr.msk.f32.mxu1 %vm4033_vm0, %v4034_v1  ;;  %326 = vmatprep.mubr.f32.mxu0 %v4034_v1  ;;  %p3999_p2 = scmp.ne.s32.totalorder %s3188_s21, %s3998_s22  ;;  %p4004_p4 = scmp.lt.s32.totalorder %s3998_s22, %s3998_s22 }
  0x33   :  { %3654 = vrot.lane.b32.xlu0 %v4095_v5, %s4036_s12  ;;  %p4005_p5 = por %p4004_p4, %p4003_p3 }
  0x34   :  { %3659 = vrot.lane.b32.xlu1 %v3638_v12, %s4036_s12 }
  0x35   :  { %p4006_p6 = pnand %p4005_p5, %p3999_p2 }
  0x37   :  { %3664 = vrot.lane.b32.xlu0 %v4097_v9, %s4036_s12 }
  0x38   :  { %3669 = vrot.lane.b32.xlu1 %v3648_v13, %s4036_s12 }
  0x3b   :  { %3674 = vrot.lane.b32.xlu0 %v4095_v5, %s4037_s13 }
  0x3c   :  { %3679 = vrot.lane.b32.xlu1 %v3638_v12, %s4037_s13 }
  0x3f   :  { %3684 = vrot.lane.b32.xlu0 %v4097_v9, %s4037_s13 }
  0x40   :  { %3689 = vrot.lane.b32.xlu1 %v3648_v13, %s4037_s13 }
  0x43   :  { %3694 = vrot.lane.b32.xlu0 %v4095_v5, %s4038_s14 }
  0x44   :  { %3699 = vrot.lane.b32.xlu1 %v3638_v12, %s4038_s14 }
  0x47   :  { %3704 = vrot.lane.b32.xlu0 %v4097_v9, %s4038_s14 }
  0x48   :  { %3709 = vrot.lane.b32.xlu1 %v3648_v13, %s4038_s14 }
  0x4b   :  { %3714 = vrot.lane.b32.xlu0 %v4095_v5, %s4039_s15 }
  0x4c   :  { %3719 = vrot.lane.b32.xlu1 %v3638_v12, %s4039_s15 }
  0x4f   :  { %3724 = vrot.lane.b32.xlu0 %v4097_v9, %s4039_s15 }
  0x50   :  { %3729 = vrot.lane.b32.xlu1 %v3648_v13, %s4039_s15 }
  0x53   :  { %3734 = vrot.lane.b32.xlu0 %v4095_v5, %s4040_s16 }
  0x54   :  { %3739 = vrot.lane.b32.xlu1 %v3638_v12, %s4040_s16 }
  0x57   :  { %3744 = vrot.lane.b32.xlu0 %v4097_v9, %s4040_s16 }
  0x58   :  { %3749 = vrot.lane.b32.xlu1 %v3648_v13, %s4040_s16 }
  0x5b   :  { %3754 = vrot.lane.b32.xlu0 %v4095_v5, %s4041_s17 }
  0x5c   :  { %3759 = vrot.lane.b32.xlu1 %v3638_v12, %s4041_s17 }
  0x5f   :  { %3764 = vrot.lane.b32.xlu0 %v4097_v9, %s4041_s17 }
  0x60   :  { %3769 = vrot.lane.b32.xlu1 %v3648_v13, %s4041_s17 }
  0x63   :  { %3774 = vrot.lane.b32.xlu0 %v4095_v5, %s4042_s18 }
  0x64   :  { %3779 = vrot.lane.b32.xlu1 %v3638_v12, %s4042_s18 }
  0x67   :  { %3784 = vrot.lane.b32.xlu0 %v4097_v9, %s4042_s18 }
  0x68   :  { %3789 = vrot.lane.b32.xlu1 %v3648_v13, %s4042_s18 }
  0x6b   :  { %3794 = vrot.lane.b32.xlu0 %v3793_v27, %s4035_s2 }
  0x6c   :  { %3799 = vrot.lane.b32.xlu1 %v3798_v28, %s4035_s2 }
  0x6f   :  { %3804 = vrot.lane.b32.xlu0 %v3803_v31, %s4035_s2 }
  0x70   :  { %3809 = vrot.lane.b32.xlu1 %v3808_v32, %s4035_s2 }
  0x73   :  { %3814 = vrot.lane.b32.xlu0 %v3793_v27, %s4036_s12 }
  0x74   :  { %3819 = vrot.lane.b32.xlu1 %v3798_v28, %s4036_s12 }
  0x77   :  { %3824 = vrot.lane.b32.xlu0 %v3803_v31, %s4036_s12 }
  0x78   :  { %3829 = vrot.lane.b32.xlu1 %v3808_v32, %s4036_s12 }
  0x7b   :  { %3834 = vrot.lane.b32.xlu0 %v3793_v27, %s4037_s13 }
  0x7c   :  { %3839 = vrot.lane.b32.xlu1 %v3798_v28, %s4037_s13 }
  0x7f   :  { %3844 = vrot.lane.b32.xlu0 %v3803_v31, %s4037_s13 }
  0x80   :  { %3849 = vrot.lane.b32.xlu1 %v3808_v32, %s4037_s13 }
  0x83   :  { %3854 = vrot.lane.b32.xlu0 %v3793_v27, %s4038_s14 }
  0x84   :  { %3859 = vrot.lane.b32.xlu1 %v3798_v28, %s4038_s14 }
  0x87   :  { %3864 = vrot.lane.b32.xlu0 %v3803_v31, %s4038_s14 }
  0x88   :  { %3869 = vrot.lane.b32.xlu1 %v3808_v32, %s4038_s14 }
  0x8b   :  { %3874 = vrot.lane.b32.xlu0 %v3793_v27, %s4039_s15 }
  0x8c   :  { %3879 = vrot.lane.b32.xlu1 %v3798_v28, %s4039_s15 }
  0x8f   :  { %3884 = vrot.lane.b32.xlu0 %v3803_v31, %s4039_s15 }
  0x90   :  { %3889 = vrot.lane.b32.xlu1 %v3808_v32, %s4039_s15 }
  0x93   :  { %3894 = vrot.lane.b32.xlu0 %v3793_v27, %s4040_s16 }
  0x94   :  { %3899 = vrot.lane.b32.xlu1 %v3798_v28, %s4040_s16 }
  0x97   :  { %3904 = vrot.lane.b32.xlu0 %v3803_v31, %s4040_s16 }
  0x98   :  { %3909 = vrot.lane.b32.xlu1 %v3808_v32, %s4040_s16 }
  0x9b   :  { %3914 = vrot.lane.b32.xlu0 %v3793_v27, %s4041_s17 }
  0x9c   :  { %3919 = vrot.lane.b32.xlu1 %v3798_v28, %s4041_s17 }
  0x9d   :  { %v3635_v33 = vpop.permute.xlu0 %3634 }
  0x9e   :  { %v3645_v34 = vpop.permute.xlu1 %3644  ;;  %v3637_v35 = vunpack.i.h.bf16 %v3635_v33  ;;  %v3636_v36 = vunpack.i.l.bf16 %v3635_v33 }
  0x9f   :  { %3924 = vrot.lane.b32.xlu0 %v3803_v31, %s4041_s17  ;;  %v3646_v37 = vunpack.i.l.bf16 %v3645_v34  ;;  %v3647_v39 = vunpack.i.h.bf16 %v3645_v34 }
  0xa0   :  { %3929 = vrot.lane.b32.xlu1 %v3808_v32, %s4041_s17  ;;  %v248_v47 = vsel %vm246_vm2, %v3636_v36, %v3637_v35 }
  0xa1   :  { %v3640_v38 = vpop.permute.xlu0 %3639  ;;  %v247_v45 = vsel %vm246_vm2, %v3646_v37, %v3636_v36 }
  0xa2   :  { %v3642_v40 = vunpack.i.h.bf16 %v3640_v38  ;;  %v3641_v41 = vunpack.i.l.bf16 %v3640_v38  ;;  %v3650_v42 = vpop.permute.xlu1 %3649 }
  0xa3   :  { %v3652_v43 = vunpack.i.h.bf16 %v3650_v42  ;;  %v3651_v44 = vunpack.i.l.bf16 %v3650_v42  ;;  %3934 = vrot.lane.b32.xlu0 %v3793_v27, %s4042_s18 }
  0xa4   :  { %v250_v46 = vsel %vm246_vm2, %v3647_v39, %v3641_v41  ;;  %3939 = vrot.lane.b32.xlu1 %v3798_v28, %s4042_s18  ;;  %v251_v48 = vsel %vm246_vm2, %v3641_v41, %v3642_v40 }
  0xa5   :  { %v3425_v49 = vpack.c.bf16 %v250_v46, %v247_v45  ;;  %v252_v50 = vsel %vm246_vm2, %v3642_v40, %v3652_v43  ;;  %v249_v51 = vsel %vm246_vm2, %v3637_v35, %v3651_v44  ;;  %v3655_v52 = vpop.permute.xlu0 %3654  ;;  %v3423_v53 = vpack.c.bf16 %v251_v48, %v248_v47 }
  0xa6   :  { %v3428_v54 = vpack.c.bf16 %v252_v50, %v249_v51  ;;  %v3657_v55 = vunpack.i.h.bf16 %v3655_v52  ;;  %v3656_v56 = vunpack.i.l.bf16 %v3655_v52  ;;  %v3660_v57 = vpop.permute.xlu1 %3659 }
  0xa7   :  { %v3662_v58 = vunpack.i.h.bf16 %v3660_v57  ;;  %v3661_v59 = vunpack.i.l.bf16 %v3660_v57  ;;  %3424 = vmatprep.subr.bf16.mxu0 %v3423_v53  ;;  %3944 = vrot.lane.b32.xlu0 %v3803_v31, %s4042_s18 }
  0xa8   :  { %3429 = vmatpush3.bf16.msra.mxu1 %v3428_v54  ;;  %3949 = vrot.lane.b32.xlu1 %v3808_v32, %s4042_s18  ;;  %v424_v61 = vsel %vm422_vm3, %v3656_v56, %v3657_v55  ;;  %v4238_v32 = vld [vmem:[#allocation2 + $0x10] sm:$0xff]  ;;  %v4254_v54 = vld [vmem:[#allocation2 + $0x18] sm:$0xff] }
  0xa9   :  { %3426 = vmatpush1.bf16.msra.mxu0 %v3425_v49  ;;  %v3665_v63 = vpop.permute.xlu0 %3664  ;;  %v427_v2 = vsel %vm422_vm3, %v3661_v59, %v3662_v58  ;;  %3434 = vmatprep.subr.bf16.mxu1 %v4032_v0 }
  0xaa   :  { %v3667_v3 = vunpack.i.h.bf16 %v3665_v63  ;;  %v3666_v4 = vunpack.i.l.bf16 %v3665_v63  ;;  %v3670_v5 = vpop.permute.xlu1 %3669  ;;  %v3430_v6 = vpack.c.bf16 %v427_v2, %v424_v61 }
  0xab   :  { %v3672_v8 = vunpack.i.h.bf16 %v3670_v5  ;;  %v3671_v9 = vunpack.i.l.bf16 %v3670_v5  ;;  %3302 = vmatmul.mubr.msk.f32.vlgmr.msra.gmra.mrb[0].mxu1 %vm74_vm1, %v4219_v60  ;;  %63 = vperm.xlu0 %3953, %v60_v62  }
  0xac   :  { %v423_v10 = vsel %vm422_vm3, %v3666_v4, %v3656_v56  ;;  %v426_v11 = vsel %vm422_vm3, %v3667_v3, %v3661_v59  ;;  %3202 = vmatmul.mubr.msk.f32.vlgmr.msra.gmra.mrb[0].mxu0 %vm74_vm1, %v4219_v60  ;;  %3431 = vmatprep.subr.bf16.mxu0 %v3430_v6 }
  0xad   :  { %v3432_v12 = vpack.c.bf16 %v426_v11, %v423_v10  ;;  %v425_v13 = vsel %vm422_vm3, %v3657_v55, %v3671_v9  ;;  %v428_v14 = vsel %vm422_vm3, %v3662_v58, %v3672_v8  ;;  %v3675_v15 = vpop.permute.xlu0 %3674  ;;  %3308 = vmatprep.mubr.msk.f32.mxu1 %vm4033_vm0, %v4034_v1  ;;  %502 = vmatprep.mubr.f32.mxu0 %v4034_v1 }
  0xae   :  { %v3435_v16 = vpack.c.bf16 %v428_v14, %v425_v13  ;;  %v3677_v27 = vunpack.i.h.bf16 %v3675_v15  ;;  %v3676_v28 = vunpack.i.l.bf16 %v3675_v15  ;;  %v3680_v29 = vpop.permute.xlu1 %3679  ;;  %v4270_v15 = vld [vmem:[#allocation2 + $0x20] sm:$0xff] }
  0xaf   :  { %v3682_v30 = vunpack.i.h.bf16 %v3680_v29  ;;  %v3681_v31 = vunpack.i.l.bf16 %v3680_v29  ;;  %3433 = vmatpush1.bf16.msra.mxu0 %v3432_v12 }
  0xb0   :  { %3436 = vmatpush3.bf16.msra.mxu1 %v3435_v16  ;;  %v600_v33 = vsel %vm598_vm4, %v3676_v28, %v3677_v27 }
  0xb1   :  { %v3685_v34 = vpop.permute.xlu0 %3684  ;;  %v603_v35 = vsel %vm598_vm4, %v3681_v31, %v3682_v30  ;;  %3441 = vmatprep.subr.bf16.mxu1 %v4032_v0 }
  0xb2   :  { %v3687_v36 = vunpack.i.h.bf16 %v3685_v34  ;;  %v3686_v37 = vunpack.i.l.bf16 %v3685_v34  ;;  %v3690_v38 = vpop.permute.xlu1 %3689  ;;  %v3437_v39 = vpack.c.bf16 %v603_v35, %v600_v33 }
  0xb3   :  { %v3692_v40 = vunpack.i.h.bf16 %v3690_v38  ;;  %v3691_v41 = vunpack.i.l.bf16 %v3690_v38  ;;  %3309 = vmatmul.mubr.msk.f32.vlgmr.msra.gmra.mrb[0].mxu1 %vm74_vm1, %v4238_v32 }
  0xb4   :  { %v599_v42 = vsel %vm598_vm4, %v3686_v37, %v3676_v28  ;;  %v602_v43 = vsel %vm598_vm4, %v3687_v36, %v3681_v31  ;;  %3204 = vmatmul.mubr.msk.f32.vlgmr.msra.gmra.mrb[0].mxu0 %vm74_vm1, %v4238_v32  ;;  %3438 = vmatprep.subr.bf16.mxu0 %v3437_v39 }
  0xb5   :  { %v3439_v44 = vpack.c.bf16 %v602_v43, %v599_v42  ;;  %v601_v45 = vsel %vm598_vm4, %v3677_v27, %v3691_v41  ;;  %v604_v46 = vsel %vm598_vm4, %v3682_v30, %v3692_v40  ;;  %v3695_v47 = vpop.permute.xlu0 %3694  ;;  %3315 = vmatprep.mubr.msk.f32.mxu1 %vm4033_vm0, %v4034_v1  ;;  %678 = vmatprep.mubr.f32.mxu0 %v4034_v1 }
  0xb6   :  { %v3442_v48 = vpack.c.bf16 %v604_v46, %v601_v45  ;;  %v3697_v49 = vunpack.i.h.bf16 %v3695_v47  ;;  %v3696_v50 = vunpack.i.l.bf16 %v3695_v47  ;;  %v3700_v51 = vpop.permute.xlu1 %3699 }
  0xb7   :  { %v3702_v52 = vunpack.i.h.bf16 %v3700_v51  ;;  %v3701_v53 = vunpack.i.l.bf16 %v3700_v51  ;;  %3440 = vmatpush1.bf16.msra.mxu0 %v3439_v44 }
  0xb8   :  { %3443 = vmatpush3.bf16.msra.mxu1 %v3442_v48  ;;  %v776_v55 = vsel %vm774_vm5, %v3696_v50, %v3697_v49  ;;  %v4286_v48 = vld [vmem:[#allocation2 + $0x28] sm:$0xff] }
  0xb9   :  { %v3705_v56 = vpop.permute.xlu0 %3704  ;;  %v779_v57 = vsel %vm774_vm5, %v3701_v53, %v3702_v52  ;;  %3448 = vmatprep.subr.bf16.mxu1 %v4032_v0 }
  0xba   :  { %v3707_v58 = vunpack.i.h.bf16 %v3705_v56  ;;  %v3706_v59 = vunpack.i.l.bf16 %v3705_v56  ;;  %v3710_v61 = vpop.permute.xlu1 %3709  ;;  %v3444_v62 = vpack.c.bf16 %v779_v57, %v776_v55 }
  0xbb   :  { %v3712_v63 = vunpack.i.h.bf16 %v3710_v61  ;;  %v3711_v2 = vunpack.i.l.bf16 %v3710_v61  ;;  %3316 = vmatmul.mubr.msk.f32.vlgmr.msra.gmra.mrb[0].mxu1 %vm74_vm1, %v4254_v54 }
  0xbc   :  { %v775_v3 = vsel %vm774_vm5, %v3706_v59, %v3696_v50  ;;  %v778_v4 = vsel %vm774_vm5, %v3707_v58, %v3701_v53  ;;  %3206 = vmatmul.mubr.msk.f32.vlgmr.msra.gmra.mrb[0].mxu0 %vm74_vm1, %v4254_v54  ;;  %3445 = vmatprep.subr.bf16.mxu0 %v3444_v62 }
  0xbd   :  { %v3446_v5 = vpack.c.bf16 %v778_v4, %v775_v3  ;;  %v777_v6 = vsel %vm774_vm5, %v3697_v49, %v3711_v2  ;;  %v780_v7 = vsel %vm774_vm5, %v3702_v52, %v3712_v63  ;;  %v3715_v8 = vpop.permute.xlu0 %3714  ;;  %3322 = vmatprep.mubr.msk.f32.mxu1 %vm4033_vm0, %v4034_v1  ;;  %854 = vmatprep.mubr.f32.mxu0 %v4034_v1 }
  0xbe   :  { %v3449_v9 = vpack.c.bf16 %v780_v7, %v777_v6  ;;  %v3717_v10 = vunpack.i.h.bf16 %v3715_v8  ;;  %v3716_v11 = vunpack.i.l.bf16 %v3715_v8  ;;  %v3720_v12 = vpop.permute.xlu1 %3719 }
  0xbf   :  { %v3722_v13 = vunpack.i.h.bf16 %v3720_v12  ;;  %v3721_v14 = vunpack.i.l.bf16 %v3720_v12  ;;  %3447 = vmatpush1.bf16.msra.mxu0 %v3446_v5 }
  0xc0   :  { %3450 = vmatpush3.bf16.msra.mxu1 %v3449_v9  ;;  %v952_v16 = vsel %vm950_vm6, %v3716_v11, %v3717_v10 }
  0xc1   :  { %v3725_v27 = vpop.permute.xlu0 %3724  ;;  %v955_v28 = vsel %vm950_vm6, %v3721_v14, %v3722_v13  ;;  %3455 = vmatprep.subr.bf16.mxu1 %v4032_v0 }
  0xc2   :  { %v3727_v29 = vunpack.i.h.bf16 %v3725_v27  ;;  %v3726_v30 = vunpack.i.l.bf16 %v3725_v27  ;;  %v3730_v31 = vpop.permute.xlu1 %3729  ;;  %v3451_v33 = vpack.c.bf16 %v955_v28, %v952_v16 }
  0xc3   :  { %v3732_v34 = vunpack.i.h.bf16 %v3730_v31  ;;  %v3731_v35 = vunpack.i.l.bf16 %v3730_v31  ;;  %3323 = vmatmul.mubr.msk.f32.vlgmr.msra.gmra.mrb[0].mxu1 %vm74_vm1, %v4270_v15 }
  0xc4   :  { %v951_v36 = vsel %vm950_vm6, %v3726_v30, %v3716_v11  ;;  %v954_v37 = vsel %vm950_vm6, %v3727_v29, %v3721_v14  ;;  %3208 = vmatmul.mubr.msk.f32.vlgmr.msra.gmra.mrb[0].mxu0 %vm74_vm1, %v4270_v15  ;;  %3452 = vmatprep.subr.bf16.mxu0 %v3451_v33 }
  0xc5   :  { %v3453_v38 = vpack.c.bf16 %v954_v37, %v951_v36  ;;  %v953_v39 = vsel %vm950_vm6, %v3717_v10, %v3731_v35  ;;  %v956_v40 = vsel %vm950_vm6, %v3722_v13, %v3732_v34  ;;  %v3735_v41 = vpop.permute.xlu0 %3734  ;;  %3329 = vmatprep.mubr.msk.f32.mxu1 %vm4033_vm0, %v4034_v1  ;;  %1030 = vmatprep.mubr.f32.mxu0 %v4034_v1  ;;  %v4302_v10 = vld [vmem:[#allocation2 + $0x30] sm:$0xff] }
  0xc6   :  { %v3456_v42 = vpack.c.bf16 %v956_v40, %v953_v39  ;;  %v3737_v43 = vunpack.i.h.bf16 %v3735_v41  ;;  %v3736_v44 = vunpack.i.l.bf16 %v3735_v41  ;;  %v3740_v45 = vpop.permute.xlu1 %3739 }
  0xc7   :  { %v3742_v46 = vunpack.i.h.bf16 %v3740_v45  ;;  %v3741_v47 = vunpack.i.l.bf16 %v3740_v45  ;;  %3454 = vmatpush1.bf16.msra.mxu0 %v3453_v38 }
  0xc8   :  { %3457 = vmatpush3.bf16.msra.mxu1 %v3456_v42  ;;  %v1128_v49 = vsel %vm1126_vm7, %v3736_v44, %v3737_v43 }
  0xc9   :  { %v3745_v50 = vpop.permute.xlu0 %3744  ;;  %v1131_v51 = vsel %vm1126_vm7, %v3741_v47, %v3742_v46  ;;  %3462 = vmatprep.subr.bf16.mxu1 %v4032_v0 }
  0xca   :  { %v3747_v52 = vunpack.i.h.bf16 %v3745_v50  ;;  %v3746_v53 = vunpack.i.l.bf16 %v3745_v50  ;;  %v3750_v55 = vpop.permute.xlu1 %3749  ;;  %v3458_v56 = vpack.c.bf16 %v1131_v51, %v1128_v49 }
  0xcb   :  { %v3752_v57 = vunpack.i.h.bf16 %v3750_v55  ;;  %v3751_v58 = vunpack.i.l.bf16 %v3750_v55  ;;  %3330 = vmatmul.mubr.msk.f32.vlgmr.msra.gmra.mrb[0].mxu1 %vm74_vm1, %v4286_v48 }
  0xcc   :  { %v1127_v59 = vsel %vm1126_vm7, %v3746_v53, %v3736_v44  ;;  %v1130_v61 = vsel %vm1126_vm7, %v3747_v52, %v3741_v47  ;;  %3210 = vmatmul.mubr.msk.f32.vlgmr.msra.gmra.mrb[0].mxu0 %vm74_vm1, %v4286_v48  ;;  %3459 = vmatprep.subr.bf16.mxu0 %v3458_v56  ;;  %v4318_v44 = vld [vmem:[#allocation2 + $0x38] sm:$0xff] }
  0xcd   :  { %v3460_v62 = vpack.c.bf16 %v1130_v61, %v1127_v59  ;;  %v1129_v63 = vsel %vm1126_vm7, %v3737_v43, %v3751_v58  ;;  %v1132_v2 = vsel %vm1126_vm7, %v3742_v46, %v3752_v57  ;;  %v3755_v3 = vpop.permute.xlu0 %3754  ;;  %3336 = vmatprep.mubr.msk.f32.mxu1 %vm4033_vm0, %v4034_v1  ;;  %1206 = vmatprep.mubr.f32.mxu0 %v4034_v1 }
  0xce   :  { %v3463_v4 = vpack.c.bf16 %v1132_v2, %v1129_v63  ;;  %v3757_v5 = vunpack.i.h.bf16 %v3755_v3  ;;  %v3756_v6 = vunpack.i.l.bf16 %v3755_v3  ;;  %v3760_v7 = vpop.permute.xlu1 %3759 }
  0xcf   :  { %v3762_v8 = vunpack.i.h.bf16 %v3760_v7  ;;  %v3761_v9 = vunpack.i.l.bf16 %v3760_v7  ;;  %3461 = vmatpush1.bf16.msra.mxu0 %v3460_v62  ;;  %v4334_v7 = vld [vmem:[#allocation2 + $0x40] sm:$0xff] }
  0xd0   :  { %3464 = vmatpush3.bf16.msra.mxu1 %v3463_v4  ;;  %v1304_v11 = vsel %vm1302_vm8, %v3756_v6, %v3757_v5 }
  0xd1   :  { %v3765_v12 = vpop.permute.xlu0 %3764  ;;  %v1307_v13 = vsel %vm1302_vm8, %v3761_v9, %v3762_v8  ;;  %3469 = vmatprep.subr.bf16.mxu1 %v4032_v0 }
  0xd2   :  { %v3767_v14 = vunpack.i.h.bf16 %v3765_v12  ;;  %v3766_v16 = vunpack.i.l.bf16 %v3765_v12  ;;  %v3770_v27 = vpop.permute.xlu1 %3769  ;;  %v3465_v28 = vpack.c.bf16 %v1307_v13, %v1304_v11 }
  0xd3   :  { %v3772_v29 = vunpack.i.h.bf16 %v3770_v27  ;;  %v3771_v30 = vunpack.i.l.bf16 %v3770_v27  ;;  %3337 = vmatmul.mubr.msk.f32.vlgmr.msra.gmra.mrb[0].mxu1 %vm74_vm1, %v4302_v10 }
  0xd4   :  { %v1303_v31 = vsel %vm1302_vm8, %v3766_v16, %v3756_v6  ;;  %v1306_v33 = vsel %vm1302_vm8, %v3767_v14, %v3761_v9  ;;  %3212 = vmatmul.mubr.msk.f32.vlgmr.msra.gmra.mrb[0].mxu0 %vm74_vm1, %v4302_v10  ;;  %3466 = vmatprep.subr.bf16.mxu0 %v3465_v28 }
  0xd5   :  { %v3467_v34 = vpack.c.bf16 %v1306_v33, %v1303_v31  ;;  %v1305_v35 = vsel %vm1302_vm8, %v3757_v5, %v3771_v30  ;;  %v1308_v36 = vsel %vm1302_vm8, %v3762_v8, %v3772_v29  ;;  %v3775_v37 = vpop.permute.xlu0 %3774  ;;  %3343 = vmatprep.mubr.msk.f32.mxu1 %vm4033_vm0, %v4034_v1  ;;  %1382 = vmatprep.mubr.f32.mxu0 %v4034_v1 }
  0xd6   :  { %v3470_v38 = vpack.c.bf16 %v1308_v36, %v1305_v35  ;;  %v3777_v39 = vunpack.i.h.bf16 %v3775_v37  ;;  %v3776_v40 = vunpack.i.l.bf16 %v3775_v37  ;;  %v3780_v41 = vpop.permute.xlu1 %3779 }
  0xd7   :  { %v3782_v42 = vunpack.i.h.bf16 %v3780_v41  ;;  %v3781_v43 = vunpack.i.l.bf16 %v3780_v41  ;;  %3468 = vmatpush1.bf16.msra.mxu0 %v3467_v34 }
  0xd8   :  { %3471 = vmatpush3.bf16.msra.mxu1 %v3470_v38  ;;  %v1480_v45 = vsel %vm1478_vm9, %v3776_v40, %v3777_v39 }
  0xd9   :  { %v3785_v46 = vpop.permute.xlu0 %3784  ;;  %v1483_v47 = vsel %vm1478_vm9, %v3781_v43, %v3782_v42  ;;  %3476 = vmatprep.subr.bf16.mxu1 %v4032_v0 }
  0xda   :  { %v3787_v49 = vunpack.i.h.bf16 %v3785_v46  ;;  %v3786_v50 = vunpack.i.l.bf16 %v3785_v46  ;;  %v3790_v51 = vpop.permute.xlu1 %3789  ;;  %v3472_v52 = vpack.c.bf16 %v1483_v47, %v1480_v45 }
  0xdb   :  { %v3792_v53 = vunpack.i.h.bf16 %v3790_v51  ;;  %v3791_v55 = vunpack.i.l.bf16 %v3790_v51  ;;  %3344 = vmatmul.mubr.msk.f32.vlgmr.msra.gmra.mrb[0].mxu1 %vm74_vm1, %v4318_v44 }
  0xdc   :  { %v1479_v56 = vsel %vm1478_vm9, %v3786_v50, %v3776_v40  ;;  %v1482_v57 = vsel %vm1478_vm9, %v3787_v49, %v3781_v43  ;;  %3214 = vmatmul.mubr.msk.f32.vlgmr.msra.gmra.mrb[0].mxu0 %vm74_vm1, %v4318_v44  ;;  %3473 = vmatprep.subr.bf16.mxu0 %v3472_v52 }
  0xdd   :  { %v3474_v58 = vpack.c.bf16 %v1482_v57, %v1479_v56  ;;  %v1481_v59 = vsel %vm1478_vm9, %v3777_v39, %v3791_v55  ;;  %v1484_v61 = vsel %vm1478_vm9, %v3782_v42, %v3792_v53  ;;  %v3795_v62 = vpop.permute.xlu0 %3794  ;;  %3350 = vmatprep.mubr.msk.f32.mxu1 %vm4033_vm0, %v4034_v1  ;;  %1558 = vmatprep.mubr.f32.mxu0 %v4034_v1 }
  0xde   :  { %v3477_v63 = vpack.c.bf16 %v1484_v61, %v1481_v59  ;;  %v3797_v2 = vunpack.i.h.bf16 %v3795_v62  ;;  %v3796_v3 = vunpack.i.l.bf16 %v3795_v62  ;;  %v3800_v4 = vpop.permute.xlu1 %3799 }
  0xdf   :  { %v3802_v5 = vunpack.i.h.bf16 %v3800_v4  ;;  %v3801_v6 = vunpack.i.l.bf16 %v3800_v4  ;;  %3475 = vmatpush1.bf16.msra.mxu0 %v3474_v58 }
  0xe0   :  { %3478 = vmatpush3.bf16.msra.mxu1 %v3477_v63  ;;  %3480 = vmatprep.subr.bf16.mxu0 %v3479_v24  ;;  %v1819_v8 = vsel %vm246_vm2, %v3796_v3, %v3797_v2 }
  0xe1   :  { %v3805_v9 = vpop.permute.xlu0 %3804  ;;  %3483 = vmatprep.subr.bf16.mxu1 %v4032_v0  ;;  %v1822_v11 = vsel %vm246_vm2, %v3801_v6, %v3802_v5 }
  0xe2   :  { %v3807_v12 = vunpack.i.h.bf16 %v3805_v9  ;;  %v3806_v13 = vunpack.i.l.bf16 %v3805_v9  ;;  %v3810_v14 = vpop.permute.xlu1 %3809  ;;  %v3486_v16 = vpack.c.bf16 %v1822_v11, %v1819_v8 }
  0xe3   :  { %v3812_v27 = vunpack.i.h.bf16 %v3810_v14  ;;  %v3811_v28 = vunpack.i.l.bf16 %v3810_v14  ;;  %3351 = vmatmul.mubr.msk.f32.vlgmr.msra.gmra.mrb[0].mxu1 %vm74_vm1, %v4334_v7 }
  0xe4   :  { %v1818_v29 = vsel %vm246_vm2, %v3806_v13, %v3796_v3  ;;  %v1821_v18 = vsel %vm246_vm2, %v3807_v12, %v3801_v6  ;;  %3216 = vmatmul.mubr.msk.f32.vlgmr.msra.gmra.mrb[0].mxu0 %vm74_vm1, %v4334_v7  ;;  %3485 = vmatpush3.bf16.msra.mxu1 %v3484_v25 }
  0xe5   :  { %v3488_v20 = vpack.c.bf16 %v1821_v18, %v1818_v29  ;;  %v1820_v24 = vsel %vm246_vm2, %v3797_v2, %v3811_v28  ;;  %v1823_v30 = vsel %vm246_vm2, %v3802_v5, %v3812_v27  ;;  %3482 = vmatpush1.bf16.msra.mxu0 %v3481_v26  ;;  %3357 = vmatprep.mubr.msk.f32.mxu1 %vm4033_vm0, %v4034_v1  ;;  %v3815_v31 = vpop.permute.xlu0 %3814 }
  0xe6   :  { %v3491_v33 = vpack.c.bf16 %v1823_v30, %v1820_v24  ;;  %v3817_v34 = vunpack.i.h.bf16 %v3815_v31  ;;  %v3816_v35 = vunpack.i.l.bf16 %v3815_v31  ;;  %v3820_v36 = vpop.permute.xlu1 %3819  ;;  %1714 = vmatprep.mubr.f32.mxu0 %v4034_v1  ;;  %3487 = vmatprep.subr.bf16.mxu0 %v3486_v16 }
  0xe7   :  { %v3822_v19 = vunpack.i.h.bf16 %v3820_v36  ;;  %v3821_v21 = vunpack.i.l.bf16 %v3820_v36  ;;  %3358 = vmatmul.mubr.msk.f32.vlgmr.msra.gmra.mrb[2].mxu1 %vm74_vm1, %v4111_v17  ;;  %3490 = vmatprep.subr.bf16.mxu1 %v4032_v0 }
  0xe8   :  { %3218 = vmatmul.mubr.msk.f32.vlgmr.msra.gmra.mrb[2].mxu0 %vm74_vm1, %v4111_v17  ;;  %3492 = vmatpush3.bf16.msra.mxu1 %v3491_v33  ;;  %v1991_v22 = vsel %vm422_vm3, %v3816_v35, %v3817_v34 }
  0xe9   :  { %3489 = vmatpush1.bf16.msra.mxu0 %v3488_v20  ;;  %v3825_v23 = vpop.permute.xlu0 %3824  ;;  %3364 = vmatprep.mubr.msk.f32.mxu1 %vm4033_vm0, %v4034_v1  ;;  %v1994_v25 = vsel %vm422_vm3, %v3821_v21, %v3822_v19 }
  0xea   :  { %v3827_v26 = vunpack.i.h.bf16 %v3825_v23  ;;  %v3826_v37 = vunpack.i.l.bf16 %v3825_v23  ;;  %v3830_v38 = vpop.permute.xlu1 %3829  ;;  %1894 = vmatprep.mubr.f32.mxu0 %v4034_v1  ;;  %v3493_v39 = vpack.c.bf16 %v1994_v25, %v1991_v22  ;;  %3497 = vmatprep.subr.bf16.mxu1 %v4032_v0 }
  0xeb   :  { %v3832_v40 = vunpack.i.h.bf16 %v3830_v38  ;;  %v3831_v17 = vunpack.i.l.bf16 %v3830_v38 }
  0xec   :  { %v1990_v41 = vsel %vm422_vm3, %v3826_v37, %v3816_v35  ;;  %v1993_v42 = vsel %vm422_vm3, %v3827_v26, %v3821_v21  ;;  %3494 = vmatprep.subr.bf16.mxu0 %v3493_v39 }
  0xed   :  { %v3495_v43 = vpack.c.bf16 %v1993_v42, %v1990_v41  ;;  %v1992_v45 = vsel %vm422_vm3, %v3817_v34, %v3831_v17  ;;  %v1995_v46 = vsel %vm422_vm3, %v3822_v19, %v3832_v40  ;;  %v3835_v47 = vpop.permute.xlu0 %3834 }
  0xee   :  { %v3498_v49 = vpack.c.bf16 %v1995_v46, %v1992_v45  ;;  %v3837_v50 = vunpack.i.h.bf16 %v3835_v47  ;;  %v3836_v51 = vunpack.i.l.bf16 %v3835_v47  ;;  %v3840_v52 = vpop.permute.xlu1 %3839 }
  0xef   :  { %v3842_v53 = vunpack.i.h.bf16 %v3840_v52  ;;  %v3841_v55 = vunpack.i.l.bf16 %v3840_v52  ;;  %3365 = vmatmul.mubr.msk.f32.vlgmr.msra.gmra.mrb[2].mxu1 %vm74_vm1, %v4219_v60 }
  0xf0   :  { %3220 = vmatmul.mubr.msk.f32.vlgmr.msra.gmra.mrb[2].mxu0 %vm74_vm1, %v4219_v60  ;;  %3499 = vmatpush3.bf16.msra.mxu1 %v3498_v49  ;;  %v2163_v56 = vsel %vm598_vm4, %v3836_v51, %v3837_v50 }
  0xf1   :  { %3496 = vmatpush1.bf16.msra.mxu0 %v3495_v43  ;;  %v3845_v57 = vpop.permute.xlu0 %3844  ;;  %3371 = vmatprep.mubr.msk.f32.mxu1 %vm4033_vm0, %v4034_v1  ;;  %v2166_v58 = vsel %vm598_vm4, %v3841_v55, %v3842_v53 }
  0xf2   :  { %v3847_v59 = vunpack.i.h.bf16 %v3845_v57  ;;  %v3846_v61 = vunpack.i.l.bf16 %v3845_v57  ;;  %v3850_v62 = vpop.permute.xlu1 %3849  ;;  %2066 = vmatprep.mubr.f32.mxu0 %v4034_v1  ;;  %v3500_v63 = vpack.c.bf16 %v2166_v58, %v2163_v56  ;;  %3504 = vmatprep.subr.bf16.mxu1 %v4032_v0 }
  0xf3   :  { %v3852_v2 = vunpack.i.h.bf16 %v3850_v62  ;;  %v3851_v60 = vunpack.i.l.bf16 %v3850_v62 }
  0xf4   :  { %v2162_v3 = vsel %vm598_vm4, %v3846_v61, %v3836_v51  ;;  %v2165_v4 = vsel %vm598_vm4, %v3847_v59, %v3841_v55  ;;  %3501 = vmatprep.subr.bf16.mxu0 %v3500_v63 }
  0xf5   :  { %v3502_v5 = vpack.c.bf16 %v2165_v4, %v2162_v3  ;;  %v2164_v6 = vsel %vm598_vm4, %v3837_v50, %v3851_v60  ;;  %v2167_v8 = vsel %vm598_vm4, %v3842_v53, %v3852_v2  ;;  %v3855_v9 = vpop.permute.xlu0 %3854 }
  0xf6   :  { %v3505_v11 = vpack.c.bf16 %v2167_v8, %v2164_v6  ;;  %v3857_v12 = vunpack.i.h.bf16 %v3855_v9  ;;  %v3856_v13 = vunpack.i.l.bf16 %v3855_v9  ;;  %v3860_v14 = vpop.permute.xlu1 %3859 }
  0xf7   :  { %v3862_v16 = vunpack.i.h.bf16 %v3860_v14  ;;  %v3861_v27 = vunpack.i.l.bf16 %v3860_v14  ;;  %3372 = vmatmul.mubr.msk.f32.vlgmr.msra.gmra.mrb[2].mxu1 %vm74_vm1, %v4238_v32 }
  0xf8   :  { %3222 = vmatmul.mubr.msk.f32.vlgmr.msra.gmra.mrb[2].mxu0 %vm74_vm1, %v4238_v32  ;;  %3506 = vmatpush3.bf16.msra.mxu1 %v3505_v11  ;;  %v2335_v28 = vsel %vm774_vm5, %v3856_v13, %v3857_v12 }
  0xf9   :  { %3503 = vmatpush1.bf16.msra.mxu0 %v3502_v5  ;;  %v3865_v29 = vpop.permute.xlu0 %3864  ;;  %3378 = vmatprep.mubr.msk.f32.mxu1 %vm4033_vm0, %v4034_v1  ;;  %v2338_v18 = vsel %vm774_vm5, %v3861_v27, %v3862_v16 }
  0xfa   :  { %v3867_v20 = vunpack.i.h.bf16 %v3865_v29  ;;  %v3866_v24 = vunpack.i.l.bf16 %v3865_v29  ;;  %v3870_v30 = vpop.permute.xlu1 %3869  ;;  %2238 = vmatprep.mubr.f32.mxu0 %v4034_v1  ;;  %v3507_v31 = vpack.c.bf16 %v2338_v18, %v2335_v28  ;;  %3511 = vmatprep.subr.bf16.mxu1 %v4032_v0 }
  0xfb   :  { %v3872_v33 = vunpack.i.h.bf16 %v3870_v30  ;;  %v3871_v32 = vunpack.i.l.bf16 %v3870_v30 }
  0xfc   :  { %v2334_v34 = vsel %vm774_vm5, %v3866_v24, %v3856_v13  ;;  %v2337_v35 = vsel %vm774_vm5, %v3867_v20, %v3861_v27  ;;  %3508 = vmatprep.subr.bf16.mxu0 %v3507_v31 }
  0xfd   :  { %v3509_v36 = vpack.c.bf16 %v2337_v35, %v2334_v34  ;;  %v2336_v19 = vsel %vm774_vm5, %v3857_v12, %v3871_v32  ;;  %v2339_v21 = vsel %vm774_vm5, %v3862_v16, %v3872_v33  ;;  %v3875_v22 = vpop.permute.xlu0 %3874 }
  0xfe   :  { %v3512_v23 = vpack.c.bf16 %v2339_v21, %v2336_v19  ;;  %v3877_v25 = vunpack.i.h.bf16 %v3875_v22  ;;  %v3876_v26 = vunpack.i.l.bf16 %v3875_v22  ;;  %v3880_v37 = vpop.permute.xlu1 %3879 }
  0xff   :  { %v3882_v38 = vunpack.i.h.bf16 %v3880_v37  ;;  %v3881_v39 = vunpack.i.l.bf16 %v3880_v37  ;;  %3379 = vmatmul.mubr.msk.f32.vlgmr.msra.gmra.mrb[2].mxu1 %vm74_vm1, %v4254_v54 }
 0x100   :  { %3224 = vmatmul.mubr.msk.f32.vlgmr.msra.gmra.mrb[2].mxu0 %vm74_vm1, %v4254_v54  ;;  %3513 = vmatpush3.bf16.msra.mxu1 %v3512_v23  ;;  %v2507_v40 = vsel %vm950_vm6, %v3876_v26, %v3877_v25 }
 0x101   :  { %3510 = vmatpush1.bf16.msra.mxu0 %v3509_v36  ;;  %v3885_v17 = vpop.permute.xlu0 %3884  ;;  %3385 = vmatprep.mubr.msk.f32.mxu1 %vm4033_vm0, %v4034_v1  ;;  %v2510_v41 = vsel %vm950_vm6, %v3881_v39, %v3882_v38 }
 0x102   :  { %v3887_v42 = vunpack.i.h.bf16 %v3885_v17  ;;  %v3886_v43 = vunpack.i.l.bf16 %v3885_v17  ;;  %v3890_v45 = vpop.permute.xlu1 %3889  ;;  %2410 = vmatprep.mubr.f32.mxu0 %v4034_v1  ;;  %v3514_v46 = vpack.c.bf16 %v2510_v41, %v2507_v40  ;;  %3518 = vmatprep.subr.bf16.mxu1 %v4032_v0 }
 0x103   :  { %v3892_v47 = vunpack.i.h.bf16 %v3890_v45  ;;  %v3891_v54 = vunpack.i.l.bf16 %v3890_v45 }
 0x104   :  { %v2506_v49 = vsel %vm950_vm6, %v3886_v43, %v3876_v26  ;;  %v2509_v50 = vsel %vm950_vm6, %v3887_v42, %v3881_v39  ;;  %3515 = vmatprep.subr.bf16.mxu0 %v3514_v46 }
 0x105   :  { %v3516_v51 = vpack.c.bf16 %v2509_v50, %v2506_v49  ;;  %v2508_v52 = vsel %vm950_vm6, %v3877_v25, %v3891_v54  ;;  %v2511_v53 = vsel %vm950_vm6, %v3882_v38, %v3892_v47  ;;  %v3895_v55 = vpop.permute.xlu0 %3894 }
 0x106   :  { %v3519_v56 = vpack.c.bf16 %v2511_v53, %v2508_v52  ;;  %v3897_v57 = vunpack.i.h.bf16 %v3895_v55  ;;  %v3896_v58 = vunpack.i.l.bf16 %v3895_v55  ;;  %v3900_v59 = vpop.permute.xlu1 %3899 }
 0x107   :  { %v3902_v61 = vunpack.i.h.bf16 %v3900_v59  ;;  %v3901_v62 = vunpack.i.l.bf16 %v3900_v59  ;;  %3386 = vmatmul.mubr.msk.f32.vlgmr.msra.gmra.mrb[2].mxu1 %vm74_vm1, %v4270_v15 }
 0x108   :  { %3226 = vmatmul.mubr.msk.f32.vlgmr.msra.gmra.mrb[2].mxu0 %vm74_vm1, %v4270_v15  ;;  %3520 = vmatpush3.bf16.msra.mxu1 %v3519_v56  ;;  %v2679_v63 = vsel %vm1126_vm7, %v3896_v58, %v3897_v57 }
 0x109   :  { %3517 = vmatpush1.bf16.msra.mxu0 %v3516_v51  ;;  %v3905_v2 = vpop.permute.xlu0 %3904  ;;  %3392 = vmatprep.mubr.msk.f32.mxu1 %vm4033_vm0, %v4034_v1  ;;  %v2682_v60 = vsel %vm1126_vm7, %v3901_v62, %v3902_v61 }
 0x10a   :  { %v3907_v3 = vunpack.i.h.bf16 %v3905_v2  ;;  %v3906_v4 = vunpack.i.l.bf16 %v3905_v2  ;;  %v3910_v5 = vpop.permute.xlu1 %3909  ;;  %2582 = vmatprep.mubr.f32.mxu0 %v4034_v1  ;;  %v3521_v6 = vpack.c.bf16 %v2682_v60, %v2679_v63  ;;  %3525 = vmatprep.subr.bf16.mxu1 %v4032_v0 }
 0x10b   :  { %v3912_v8 = vunpack.i.h.bf16 %v3910_v5  ;;  %v3911_v15 = vunpack.i.l.bf16 %v3910_v5 }
 0x10c   :  { %v2678_v9 = vsel %vm1126_vm7, %v3906_v4, %v3896_v58  ;;  %v2681_v11 = vsel %vm1126_vm7, %v3907_v3, %v3901_v62  ;;  %3522 = vmatprep.subr.bf16.mxu0 %v3521_v6 }
 0x10d   :  { %v3523_v12 = vpack.c.bf16 %v2681_v11, %v2678_v9  ;;  %v2680_v13 = vsel %vm1126_vm7, %v3897_v57, %v3911_v15  ;;  %v2683_v14 = vsel %vm1126_vm7, %v3902_v61, %v3912_v8  ;;  %v3915_v16 = vpop.permute.xlu0 %3914 }
 0x10e   :  { %v3526_v27 = vpack.c.bf16 %v2683_v14, %v2680_v13  ;;  %v3917_v28 = vunpack.i.h.bf16 %v3915_v16  ;;  %v3916_v29 = vunpack.i.l.bf16 %v3915_v16  ;;  %v3920_v18 = vpop.permute.xlu1 %3919 }
 0x10f   :  { %v3922_v20 = vunpack.i.h.bf16 %v3920_v18  ;;  %v3921_v24 = vunpack.i.l.bf16 %v3920_v18  ;;  %3393 = vmatmul.mubr.msk.f32.vlgmr.msra.gmra.mrb[2].mxu1 %vm74_vm1, %v4286_v48 }
 0x110   :  { %3228 = vmatmul.mubr.msk.f32.vlgmr.msra.gmra.mrb[2].mxu0 %vm74_vm1, %v4286_v48  ;;  %3527 = vmatpush3.bf16.msra.mxu1 %v3526_v27  ;;  %v2851_v30 = vsel %vm1302_vm8, %v3916_v29, %v3917_v28 }
 0x111   :  { %3524 = vmatpush1.bf16.msra.mxu0 %v3523_v12  ;;  %v3925_v31 = vpop.permute.xlu0 %3924  ;;  %3399 = vmatprep.mubr.msk.f32.mxu1 %vm4033_vm0, %v4034_v1  ;;  %v2854_v33 = vsel %vm1302_vm8, %v3921_v24, %v3922_v20 }
 0x112   :  { %v3927_v32 = vunpack.i.h.bf16 %v3925_v31  ;;  %v3926_v34 = vunpack.i.l.bf16 %v3925_v31  ;;  %v3930_v35 = vpop.permute.xlu1 %3929  ;;  %2754 = vmatprep.mubr.f32.mxu0 %v4034_v1  ;;  %v3528_v36 = vpack.c.bf16 %v2854_v33, %v2851_v30  ;;  %3532 = vmatprep.subr.bf16.mxu1 %v4032_v0 }
 0x113   :  { %v3932_v19 = vunpack.i.h.bf16 %v3930_v35  ;;  %v3931_v48 = vunpack.i.l.bf16 %v3930_v35 }
 0x114   :  { %v2850_v21 = vsel %vm1302_vm8, %v3926_v34, %v3916_v29  ;;  %v2853_v22 = vsel %vm1302_vm8, %v3927_v32, %v3921_v24  ;;  %3529 = vmatprep.subr.bf16.mxu0 %v3528_v36 }
 0x115   :  { %v3530_v23 = vpack.c.bf16 %v2853_v22, %v2850_v21  ;;  %v2852_v25 = vsel %vm1302_vm8, %v3917_v28, %v3931_v48  ;;  %v2855_v26 = vsel %vm1302_vm8, %v3922_v20, %v3932_v19  ;;  %v3935_v37 = vpop.permute.xlu0 %3934 }
 0x116   :  { %v3533_v38 = vpack.c.bf16 %v2855_v26, %v2852_v25  ;;  %v3937_v39 = vunpack.i.h.bf16 %v3935_v37  ;;  %v3936_v40 = vunpack.i.l.bf16 %v3935_v37  ;;  %v3940_v17 = vpop.permute.xlu1 %3939 }
 0x117   :  { %v3942_v41 = vunpack.i.h.bf16 %v3940_v17  ;;  %v3941_v42 = vunpack.i.l.bf16 %v3940_v17  ;;  %3400 = vmatmul.mubr.msk.f32.vlgmr.msra.gmra.mrb[2].mxu1 %vm74_vm1, %v4302_v10 }
 0x118   :  { %3230 = vmatmul.mubr.msk.f32.vlgmr.msra.gmra.mrb[2].mxu0 %vm74_vm1, %v4302_v10  ;;  %3534 = vmatpush3.bf16.msra.mxu1 %v3533_v38  ;;  %v3023_v43 = vsel %vm1478_vm9, %v3936_v40, %v3937_v39 }
 0x119   :  { %3531 = vmatpush1.bf16.msra.mxu0 %v3530_v23  ;;  %v3945_v45 = vpop.permute.xlu0 %3944  ;;  %3406 = vmatprep.mubr.msk.f32.mxu1 %vm4033_vm0, %v4034_v1  ;;  %v3026_v46 = vsel %vm1478_vm9, %v3941_v42, %v3942_v41 }
 0x11a   :  { %v3947_v47 = vunpack.i.h.bf16 %v3945_v45  ;;  %v3946_v54 = vunpack.i.l.bf16 %v3945_v45  ;;  %v3950_v49 = vpop.permute.xlu1 %3949  ;;  %2926 = vmatprep.mubr.f32.mxu0 %v4034_v1  ;;  %v3535_v50 = vpack.c.bf16 %v3026_v46, %v3023_v43  ;;  %3539 = vmatprep.subr.bf16.mxu1 %v4032_v0 }
 0x11b   :  { %v3952_v51 = vunpack.i.h.bf16 %v3950_v49  ;;  %v3951_v10 = vunpack.i.l.bf16 %v3950_v49 }
 0x11c   :  { %v3022_v52 = vsel %vm1478_vm9, %v3946_v54, %v3936_v40  ;;  %v3025_v53 = vsel %vm1478_vm9, %v3947_v47, %v3941_v42  ;;  %3536 = vmatprep.subr.bf16.mxu0 %v3535_v50 }
 0x11d   :  { %v3537_v55 = vpack.c.bf16 %v3025_v53, %v3022_v52  ;;  %v3024_v56 = vsel %vm1478_vm9, %v3937_v39, %v3951_v10  ;;  %v3027_v57 = vsel %vm1478_vm9, %v3942_v41, %v3952_v51 }
 0x11e   :  { %v3540_v58 = vpack.c.bf16 %v3027_v57, %v3024_v56 }
 0x11f   :  { %3407 = vmatmul.mubr.msk.f32.vlgmr.msra.gmra.mrb[2].mxu1 %vm74_vm1, %v4318_v44 }
 0x120   :  { %3232 = vmatmul.mubr.msk.f32.vlgmr.msra.gmra.mrb[2].mxu0 %vm74_vm1, %v4318_v44  ;;  %3541 = vmatpush3.bf16.msra.mxu1 %v3540_v58 }
 0x121   :  { %3538 = vmatpush1.bf16.msra.mxu0 %v3537_v55  ;;  %3413 = vmatprep.mubr.msk.f32.mxu1 %vm4033_vm0, %v4034_v1 }
 0x122   :  { %3098 = vmatprep.mubr.f32.mxu0 %v4034_v1 }
 0x127   :  { %3414 = vmatmul.mubr.msk.f32.vlgmr.msra.gmra.mrb[2].mxu1 %vm74_vm1, %v4334_v7 }
 0x128   :  { %3234 = vmatmul.mubr.msk.f32.vlgmr.msra.gmra.mrb[2].mxu0 %vm74_vm1, %v4334_v7 }
 0x12a   :  { %v64_v0 = vpop.permute.xlu0 %63 }
 0x1b6   :  { %v1631_v59 = vpop.f32.mrb[0].mxu1 }
 0x1b7   :  { %v3544_v61 = vadd.f32 %v1631_v59, %v64_v0  ;;  %v1560_v62 = vpop.f32.mrb[0].mxu0  ;;  %v3352_v63 = vpop.f32.mrb[1].mxu1 }
 0x1b8   :  { %v3542_v2 = vadd.f32 %v1560_v62, %v64_v0  ;;  %v1562_v44 = vpop.f32.mrb[1].mxu0 }
 0x1b9   :  { %1640 = vst [vmem:[#allocation7 + $0x10] sm:$0xff] %v3544_v61  ;;  %v3543_v60 = vadd.f32 %v1562_v44, %v64_v0 }
 0x1ba   :  { %1638 = vst [vmem:[#allocation7] sm:$0xff] %v3542_v2 }
 0x1bb   :  { %1639 = vst [vmem:[#allocation7 + $0x8] sm:$0xff] %v3543_v60 }
 0x1fa   :  { %v3171_v1 = vpop.f32.mrb[2].mxu1 }
 0x1fb   :  { %v3547_v3 = vadd.f32 %v3171_v1, %v64_v0  ;;  %v3100_v4 = vpop.f32.mrb[2].mxu0  ;;  %v3415_v5 = vpop.f32.mrb[3].mxu1 }
 0x1fc   :  { %v3545_v6 = vadd.f32 %v3100_v4, %v64_v0  ;;  %v3102_v8 = vpop.f32.mrb[3].mxu0 }
 0x1fd   :  { %3181 = vst [vmem:[#allocation7 + $0x28] sm:$0xff] %v3547_v3  ;;  %v3546_v7 = vadd.f32 %v3102_v8, %v64_v0 }
 0x1fe   :  { %3179 = vst [vmem:[#allocation7 + $0x18] sm:$0xff] %v3545_v6 }
 0x1ff   :  { %3180 = vst [vmem:[#allocation7 + $0x20] sm:$0xff] %v3546_v7 }
 0x200   :  { %4009 = shalt.err (!%p4006_p6)
}
 0x201   :  { %s4010_s25 = scalar_lea.hbm %s4484_s3, 768 }
 0x202   :  { %p4011_p7 = scmp.ne.s32.totalorder %s4484_s3, %s4010_s25  ;;  %p4014_p8 = scmp.lt.u32.totalorder %s4010_s25, %s4484_s3 }
 0x204   :  { %p4016_p9 = pnand %p4014_p8, %p4011_p7 }
 0x206   :  { %4019 = shalt.err (!%p4016_p9)
}
 0x207   :  { %s4045_s30 = smov 384   ;;  %s4046_s4 = smov 24  }
 0x208   :  { %3193 = dma.vmem_to_hbm [thread:$0]  %s3188_s21, 768, %s4484_s3, [#allocation4], %s4045_s30, %s4045_s30, %s4046_s4  }
 0x209   :  { %4024 = dma.done.wait [#allocation4], 768  }
 0x20a   :  { %4025 = vsyncadd [#allocation4], 4294966528 }
 0x20b   :  { %3197 = vsyncpa [#allocation3], 1 }
 0x20c   :  { %3198 = vsyncpa [#allocation6], 1 }
 0x20d   :  { %3199 = vsyncpa [#allocation4], 1 }

</bundles_post_ra>
